<compile_context>
chip_gen: v6e
topology: v6e:2x2x1
jax: 0.10.0
libtpu: 0.0.40
codegen_flags: <defaults>
</compile_context>

<pallas_src>
import functools

import jax
import jax.numpy as jnp
from jax.experimental import pallas as pl
from jax.experimental.pallas import tpu as pltpu

_CIN = 256 * 4 * 4    # 4096
_HID = 128
_N_DISC = 100
_MU_COL = 100
_VAR_COL = 101
_HEAD_PAD = 128       # fused head output width (lane-dense)


def _round_up(n, m):
    return ((n + m - 1) // m) * m


def _choose_tm(batch):
    # Small batches: one padded tile (multiple of 8 sublanes).
    # Large batches: 512-row tiles -> bf16 x double-buffer ~8 MiB, safe on
    # v5e(16 MiB scoped) / v6e(32 MiB) / v7x(64 MiB physical).
    if batch <= 512:
        return max(8, _round_up(batch, 8))
    return 512


def _qhead_kernel(x_ref, w1_ref, b1_ref, wh_ref, bh_ref, out_ref):
    # conv1(4x4, valid) + folded BN scale: (TM, 4096)bf16 @ (4096, 128)bf16
    h = jnp.dot(x_ref[...], w1_ref[...], preferred_element_type=jnp.float32)
    # folded BN shift
    h = h + b1_ref[...]
    # leaky_relu(negative_slope=0.1)
    h = jnp.where(h > 0, h, 0.1 * h)
    # fused heads: columns [0:100]=disc, 100=mu, 101=var, 102:128=zero pad
    o = jnp.dot(h.astype(jnp.bfloat16), wh_ref[...],
                preferred_element_type=jnp.float32) + bh_ref[...]
    # exp() only on the var column (lane 101); disc/mu lanes pass through
    lane = jax.lax.broadcasted_iota(jnp.int32, o.shape, 1)
    out_ref[...] = jnp.where(lane == _VAR_COL, jnp.exp(o), o)


def prepare_qhead_params(params):
    """One-time parameter folding / packing (done outside the per-call path)."""
    eps = 1e-5
    scale = params["bn_gamma"] / jnp.sqrt(params["bn_running_var"] + eps)  # (128,)
    shift = params["bn_beta"] - params["bn_running_mean"] * scale          # (128,)

    # conv1 weight -> (4096, 128), BN scale folded into columns, bf16 for MXU.
    w1 = params["conv1_w"].reshape(_HID, _CIN).T * scale[None, :]
    w1 = w1.astype(jnp.bfloat16)
    b1 = shift.reshape(1, _HID).astype(jnp.float32)

    # fused head weight (128, 128) and bias (1, 128), zero-padded 102 -> 128.
    wd = params["conv_disc_w"].reshape(_N_DISC, _HID).T   # (128, 100)
    wm = params["conv_mu_w"].reshape(1, _HID).T           # (128, 1)
    wv = params["conv_var_w"].reshape(1, _HID).T          # (128, 1)
    wh = jnp.zeros((_HID, _HEAD_PAD), jnp.float32)
    wh = wh.at[:, :_N_DISC].set(wd)
    wh = wh.at[:, _MU_COL:_MU_COL + 1].set(wm)
    wh = wh.at[:, _VAR_COL:_VAR_COL + 1].set(wv)
    wh = wh.astype(jnp.bfloat16)

    bh = jnp.zeros((1, _HEAD_PAD), jnp.float32)
    bh = bh.at[0, :_N_DISC].set(params["conv_disc_b"])
    bh = bh.at[0, _MU_COL].set(params["conv_mu_b"][0])
    bh = bh.at[0, _VAR_COL].set(params["conv_var_b"][0])

    return {"w1": w1, "b1": b1, "wh": wh, "bh": bh}


@functools.partial(jax.jit, static_argnames=())
def qhead_forward(x_nchw, prep):
    """x_nchw: (B, 256, 4, 4) f32. Returns (disc (B,100), mu (B,), var (B,))."""
    B = x_nchw.shape[0]
    x = x_nchw.reshape(B, _CIN).astype(jnp.bfloat16)

    tm = _choose_tm(B)
    b_pad = _round_up(B, tm)
    if b_pad != B:
        x = jnp.pad(x, ((0, b_pad - B), (0, 0)))
    grid = (b_pad // tm,)

    cost = pl.CostEstimate(
        flops=2 * b_pad * _CIN * _HID + 2 * b_pad * _HID * _HEAD_PAD,
        transcendentals=b_pad * _HEAD_PAD,
        bytes_accessed=(b_pad * _CIN * 2            # x (bf16)
                        + _CIN * _HID * 2           # w1 (bf16)
                        + _HID * _HEAD_PAD * 2      # wh (bf16)
                        + 2 * _HEAD_PAD * 4         # biases
                        + b_pad * _HEAD_PAD * 4),   # out (f32)
    )

    out = pl.pallas_call(
        _qhead_kernel,
        out_shape=jax.ShapeDtypeStruct((b_pad, _HEAD_PAD), jnp.float32),
        grid=grid,
        in_specs=[
            pl.BlockSpec((tm, _CIN), lambda i: (i, 0)),          # x tile
            pl.BlockSpec((_CIN, _HID), lambda i: (0, 0)),        # w1 (resident)
            pl.BlockSpec((1, _HID), lambda i: (0, 0)),           # b1
            pl.BlockSpec((_HID, _HEAD_PAD), lambda i: (0, 0)),   # fused heads
            pl.BlockSpec((1, _HEAD_PAD), lambda i: (0, 0)),      # fused bias
        ],
        out_specs=pl.BlockSpec((tm, _HEAD_PAD), lambda i: (i, 0)),
        compiler_params=pltpu.CompilerParams(
            dimension_semantics=("parallel",)),
        cost_estimate=cost,
    )(x, prep["w1"], prep["b1"], prep["wh"], prep["bh"])

    # PyTorch .squeeze(): (B,100,1,1)->(B,100), (B,1,1,1)->(B,)
    # TODO(synk): for B == 1 PyTorch .squeeze() would also drop the batch dim.
    disc = out[:B, :_N_DISC]
    mu = out[:B, _MU_COL]
    var = out[:B, _VAR_COL]
    return disc, mu, var


def init_params(key):
    ks = jax.random.split(key, 8)
    return {
        "conv1_w": 0.02 * jax.random.normal(ks[0], (128, 256, 4, 4), jnp.float32),
        "bn_gamma": jnp.ones((128,), jnp.float32),
        "bn_beta": jnp.zeros((128,), jnp.float32),
        "bn_running_mean": 0.1 * jax.random.normal(ks[1], (128,), jnp.float32),
        "bn_running_var": jnp.ones((128,), jnp.float32)
                          + 0.05 * jax.random.uniform(ks[2], (128,)),
        "conv_disc_w": 0.02 * jax.random.normal(ks[3], (100, 128, 1, 1), jnp.float32),
        "conv_disc_b": jnp.zeros((100,), jnp.float32),
        "conv_mu_w": 0.02 * jax.random.normal(ks[4], (1, 128, 1, 1), jnp.float32),
        "conv_mu_b": jnp.zeros((1,), jnp.float32),
        "conv_var_w": 0.02 * jax.random.normal(ks[5], (1, 128, 1, 1), jnp.float32),
        "conv_var_b": jnp.zeros((1,), jnp.float32),
    }


def _reference(x_nchw, params):
    """Pure-JAX reference using the same bf16 quantization as the kernel."""
    B = x_nchw.shape[0]
    eps = 1e-5
    scale = params["bn_gamma"] / jnp.sqrt(params["bn_running_var"] + eps)
    shift = params["bn_beta"] - params["bn_running_mean"] * scale
    w1 = (params["conv1_w"].reshape(_HID, -1).T * scale[None, :]).astype(jnp.bfloat16)
    x = x_nchw.reshape(B, -1).astype(jnp.bfloat16)
    h = jnp.dot(x, w1, preferred_element_type=jnp.float32) + shift[None, :]
    h = jnp.where(h > 0, h, 0.1 * h)
    hb = h.astype(jnp.bfloat16)
    wd = params["conv_disc_w"].reshape(_N_DISC, _HID).T.astype(jnp.bfloat16)
    wm = params["conv_mu_w"].reshape(1, _HID).T.astype(jnp.bfloat16)
    wv = params["conv_var_w"].reshape(1, _HID).T.astype(jnp.bfloat16)
    disc = jnp.dot(hb, wd, preferred_element_type=jnp.float32) + params["conv_disc_b"]
    mu = (jnp.dot(hb, wm, preferred_element_type=jnp.float32)
          + params["conv_mu_b"]).reshape(B)
    var = jnp.exp(jnp.dot(hb, wv, preferred_element_type=jnp.float32)
                  + params["conv_var_b"]).reshape(B)
    return disc, mu, var


if __name__ == "__main__":
    key = jax.random.PRNGKey(0)
    k_in, k_par = jax.random.split(key)

    B = 2
    x = jax.random.normal(k_in, (B, 256, 4, 4), jnp.float32)   # NCHW like PyTorch
    params = init_params(k_par)
    prep = prepare_qhead_params(params)                        # one-time folding

    disc, mu, var = qhead_forward(x, prep)
    jax.block_until_ready((disc, mu, var))

    rd, rm, rv = _reference(x, params)
    assert disc.shape == (B, 100) and mu.shape == (B,) and var.shape == (B,)
    assert jnp.allclose(disc, rd, atol=1e-2, rtol=1e-2)
    assert jnp.allclose(mu, rm, atol=1e-2, rtol=1e-2)
    assert jnp.allclose(var, rv, atol=1e-2, rtol=1e-2)

    print("KERNEL_OK")
</pallas_src>

<mosaic_0001>
module attributes {stable_mosaic.version = 11 : i64} {
  func.func @_qhead_kernel(%arg0: i32, %arg1: memref<8x4096xbf16, #tpu.memory_space<vmem>>, %arg2: memref<4096x128xbf16, #tpu.memory_space<vmem>>, %arg3: memref<1x128xf32, #tpu.memory_space<vmem>>, %arg4: memref<128x128xbf16, #tpu.memory_space<vmem>>, %arg5: memref<1x128xf32, #tpu.memory_space<vmem>>, %arg6: memref<8x128xf32, #tpu.memory_space<vmem>>) attributes {dimension_semantics = [#tpu.dimension_semantics<parallel>], iteration_bounds = array<i64: 1>, scalar_prefetch = 0 : i64, scratch_operands = 0 : i64, tpu.core_type = #tpu.core_type<tc>, window_params = [{transform_indices = @transform_0, window_bounds = array<i64: 8, 4096>}, {pipeline_mode = #tpu.pipeline_mode<synchronous>, transform_indices = @transform_1, window_bounds = array<i64: 4096, 128>}, {pipeline_mode = #tpu.pipeline_mode<synchronous>, transform_indices = @transform_2, window_bounds = array<i64: 1, 128>}, {pipeline_mode = #tpu.pipeline_mode<synchronous>, transform_indices = @transform_3, window_bounds = array<i64: 128, 128>}, {pipeline_mode = #tpu.pipeline_mode<synchronous>, transform_indices = @transform_4, window_bounds = array<i64: 1, 128>}, {transform_indices = @transform_5, window_bounds = array<i64: 8, 128>}]} {
    %c0 = arith.constant 0 : index
    %c0_0 = arith.constant 0 : index
    %0 = vector.load %arg1[%c0, %c0_0] : memref<8x4096xbf16, #tpu.memory_space<vmem>>, vector<8x4096xbf16>
    %c0_1 = arith.constant 0 : index
    %c0_2 = arith.constant 0 : index
    %1 = vector.load %arg2[%c0_1, %c0_2] : memref<4096x128xbf16, #tpu.memory_space<vmem>>, vector<4096x128xbf16>
    %cst = arith.constant dense<0.000000e+00> : vector<8x128xf32>
    %2 = tpu.matmul %0, %1, %cst {dimension_numbers = #tpu.dot_dimension_numbers<[1], [0], [0], [1], [0, 0, 1, 1], [], []>} : vector<8x4096xbf16>, vector<4096x128xbf16>, vector<8x128xf32> -> vector<8x128xf32>
    %c0_3 = arith.constant 0 : index
    %c0_4 = arith.constant 0 : index
    %3 = vector.load %arg3[%c0_3, %c0_4] : memref<1x128xf32, #tpu.memory_space<vmem>>, vector<1x128xf32>
    %4 = vector.broadcast %3 : vector<1x128xf32> to vector<8x128xf32>
    %5 = arith.addf %2, %4 : vector<8x128xf32>
    %cst_5 = arith.constant 0.000000e+00 : f32
    %6 = vector.broadcast %cst_5 : f32 to vector<8x128xf32>
    %7 = arith.cmpf ogt, %5, %6 : vector<8x128xf32>
    %cst_6 = arith.constant 1.000000e-01 : f32
    %8 = vector.broadcast %cst_6 : f32 to vector<8x128xf32>
    %9 = arith.mulf %8, %5 : vector<8x128xf32>
    %10 = arith.select %7, %5, %9 : vector<8x128xi1>, vector<8x128xf32>
    %11 = arith.truncf %10 : vector<8x128xf32> to vector<8x128xbf16>
    %c0_7 = arith.constant 0 : index
    %c0_8 = arith.constant 0 : index
    %12 = vector.load %arg4[%c0_7, %c0_8] : memref<128x128xbf16, #tpu.memory_space<vmem>>, vector<128x128xbf16>
    %cst_9 = arith.constant dense<0.000000e+00> : vector<8x128xf32>
    %13 = tpu.matmul %11, %12, %cst_9 {dimension_numbers = #tpu.dot_dimension_numbers<[1], [0], [0], [1], [0, 0, 1, 1], [], []>} : vector<8x128xbf16>, vector<128x128xbf16>, vector<8x128xf32> -> vector<8x128xf32>
    %c0_10 = arith.constant 0 : index
    %c0_11 = arith.constant 0 : index
    %14 = vector.load %arg5[%c0_10, %c0_11] : memref<1x128xf32, #tpu.memory_space<vmem>>, vector<1x128xf32>
    %15 = vector.broadcast %14 : vector<1x128xf32> to vector<8x128xf32>
    %16 = arith.addf %13, %15 : vector<8x128xf32>
    %17 = tpu.iota {dimensions = array<i32: 1>} : vector<8x128xi32>
    %c101_i32 = arith.constant 101 : i32
    %18 = vector.broadcast %c101_i32 : i32 to vector<8x128xi32>
    %19 = arith.cmpi eq, %17, %18 : vector<8x128xi32>
    %20 = math.exp %16 : vector<8x128xf32>
    %21 = arith.select %19, %20, %16 : vector<8x128xi1>, vector<8x128xf32>
    %c0_12 = arith.constant 0 : index
    %c0_13 = arith.constant 0 : index
    %22 = vector.load %arg6[%c0_12, %c0_13] : memref<8x128xf32, #tpu.memory_space<vmem>>, vector<8x128xf32>
    tpu.vector_store %arg6[%c0_12, %c0_13], %21 {strides = array<i32>} : memref<8x128xf32, #tpu.memory_space<vmem>>, vector<8x128xf32>,
    return
  }
  func.func @transform_0(%arg0: i32) -> (i32, i32) {
    %c0_i32 = arith.constant 0 : i32
    %c0_i32_0 = arith.constant 0 : i32
    return %arg0, %c0_i32 : i32, i32
  }
  func.func @transform_1(%arg0: i32) -> (i32, i32) {
    %c0_i32 = arith.constant 0 : i32
    %c0_i32_0 = arith.constant 0 : i32
    %c0_i32_1 = arith.constant 0 : i32
    return %c0_i32, %c0_i32_0 : i32, i32
  }
  func.func @transform_2(%arg0: i32) -> (i32, i32) {
    %c0_i32 = arith.constant 0 : i32
    %c0_i32_0 = arith.constant 0 : i32
    %c0_i32_1 = arith.constant 0 : i32
    return %c0_i32, %c0_i32_0 : i32, i32
  }
  func.func @transform_3(%arg0: i32) -> (i32, i32) {
    %c0_i32 = arith.constant 0 : i32
    %c0_i32_0 = arith.constant 0 : i32
    %c0_i32_1 = arith.constant 0 : i32
    return %c0_i32, %c0_i32_0 : i32, i32
  }
  func.func @transform_4(%arg0: i32) -> (i32, i32) {
    %c0_i32 = arith.constant 0 : i32
    %c0_i32_0 = arith.constant 0 : i32
    %c0_i32_1 = arith.constant 0 : i32
    return %c0_i32, %c0_i32_0 : i32, i32
  }
  func.func @transform_5(%arg0: i32) -> (i32, i32) {
    %c0_i32 = arith.constant 0 : i32
    %c0_i32_0 = arith.constant 0 : i32
    return %arg0, %c0_i32 : i32, i32
  }
}

</mosaic_0001>

<bundles_post_ra>
// kernel: qhead_forward.1
= control target key start
LH: loop header
LB: loop body
LE: loop exit
PB: predicated region body
PF: predicated region fallthrough
CT: control target
= control target key end

     0   :  { %vm3950_vm0 = vmmov 0   ;;  %s4833_s1 = inlined_call_operand.vmem [shape: bf16[4096,128], index: 1, kind: input, shape index: {}]   ;;  %s4834_s0 = inlined_call_operand.vmem [shape: bf16[8,4096], index: 0, kind: input, shape index: {}]   ;;  %s4835_s2 = inlined_call_operand.vmem [shape: f32[1,128], index: 2, kind: input, shape index: {}]   ;;  %s4836_s3 = inlined_call_operand.vmem [shape: bf16[128,128], index: 3, kind: input, shape index: {}]   ;;  %s4837_s4 = inlined_call_operand.vmem [shape: f32[1,128], index: 4, kind: input, shape index: {}]   ;;  %s4838_s5 = inlined_call_operand.vmem [shape: f32[8,128], index: 5, kind: output, shape index: {}]  }
   0x1   :  { %v3651_v0 = vld [vmem:[%s4833_s1 + $0x78] sm:$0xff]   ;;  %v3655_v4 = vld [vmem:[%s4833_s1 + $0x70] sm:$0xff]   ;;  %v3659_v8 = vld [vmem:[%s4833_s1 + $0x68] sm:$0xff]  }
   0x2   :  { %v3652_v1 = vld [vmem:[%s4833_s1 + $0xf8] sm:$0xff]   ;;  %3268 = vmatprep.subr.bf16.mxu0 %v3651_v0  ;;  %v3656_v5 = vld [vmem:[%s4833_s1 + $0xf0] sm:$0xff]   ;;  %v3660_v9 = vld [vmem:[%s4833_s1 + $0xe8] sm:$0xff]  }
   0x3   :  { %v3653_v2 = vld [vmem:[%s4833_s1 + $0x38] sm:$0xff]   ;;  %3290 = vmatprep.subr.bf16.mxu1 %v3652_v1  ;;  %v3657_v6 = vld [vmem:[%s4833_s1 + $0x30] sm:$0xff]   ;;  %v3661_v10 = vld [vmem:[%s4833_s1 + $0x28] sm:$0xff]  }
   0x4   :  { %v3654_v3 = vld [vmem:[%s4833_s1 + $0xb8] sm:$0xff]   ;;  %3269 = vmatpush3.bf16.msra.mxu0 %v3653_v2  ;;  %v3658_v7 = vld [vmem:[%s4833_s1 + $0xb0] sm:$0xff]   ;;  %v3662_v11 = vld [vmem:[%s4833_s1 + $0xa8] sm:$0xff]  }
   0x5   :  { %3291 = vmatpush3.bf16.msra.mxu1 %v3654_v3  ;;  %3270 = vmatprep.subr.bf16.mxu0 %v3655_v4  ;;  %v3663_v12 = vld [vmem:[%s4833_s1 + $0x60] sm:$0xff]   ;;  %v3667_v16 = vld [vmem:[%s4833_s1 + $0x58] sm:$0xff]   ;;  %v3671_v20 = vld [vmem:[%s4833_s1 + $0x50] sm:$0xff]  }
   0x6   :  { %3292 = vmatprep.subr.bf16.mxu1 %v3656_v5  ;;  %v3664_v13 = vld [vmem:[%s4833_s1 + $0xe0] sm:$0xff]   ;;  %v3668_v17 = vld [vmem:[%s4833_s1 + $0xd8] sm:$0xff]   ;;  %v3672_v21 = vld [vmem:[%s4833_s1 + $0xd0] sm:$0xff]  }
   0x7   :  { %v3665_v14 = vld [vmem:[%s4833_s1 + $0x20] sm:$0xff]   ;;  %v3669_v18 = vld [vmem:[%s4833_s1 + $0x18] sm:$0xff]   ;;  %v3673_v22 = vld [vmem:[%s4833_s1 + $0x10] sm:$0xff]  }
   0x8   :  { %3271 = vmatpush3.bf16.msra.mxu0 %v3657_v6  ;;  %v3666_v15 = vld [vmem:[%s4833_s1 + $0xa0] sm:$0xff]   ;;  %v3670_v19 = vld [vmem:[%s4833_s1 + $0x98] sm:$0xff]   ;;  %v3674_v23 = vld [vmem:[%s4833_s1 + $0x90] sm:$0xff]  }
   0x9   :  { %3293 = vmatpush3.bf16.msra.mxu1 %v3658_v7  ;;  %3272 = vmatprep.subr.bf16.mxu0 %v3659_v8  ;;  %v3675_v24 = vld [vmem:[%s4833_s1 + $0x48] sm:$0xff]   ;;  %v3679_v28 = vld [vmem:[%s4833_s1 + $0x40] sm:$0xff]   ;;  %v3687_v38 = vld [vmem:[%s4833_s1 + $0x178] sm:$0xff]  }
   0xa   :  { %3294 = vmatprep.subr.bf16.mxu1 %v3660_v9  ;;  %v3676_v25 = vld [vmem:[%s4833_s1 + $0xc8] sm:$0xff]   ;;  %v3680_v29 = vld [vmem:[%s4833_s1 + $0xc0] sm:$0xff]   ;;  %v3688_v39 = vld [vmem:[%s4833_s1 + $0x1f8] sm:$0xff]  }
   0xb   :  { %v3677_v26 = vld [vmem:[%s4833_s1 + $0x8] sm:$0xff]   ;;  %v3681_v30 = vld [vmem:[%s4833_s1] sm:$0xff]   ;;  %v3689_v40 = vld [vmem:[%s4833_s1 + $0x138] sm:$0xff]  }
   0xc   :  { %3273 = vmatpush3.bf16.msra.mxu0 %v3661_v10  ;;  %v3678_v27 = vld [vmem:[%s4833_s1 + $0x88] sm:$0xff]   ;;  %v3682_v31 = vld [vmem:[%s4833_s1 + $0x80] sm:$0xff]   ;;  %v3690_v41 = vld [vmem:[%s4833_s1 + $0x1b8] sm:$0xff]  }
   0xd   :  { %3295 = vmatpush3.bf16.msra.mxu1 %v3662_v11  ;;  %3274 = vmatprep.subr.bf16.mxu0 %v3663_v12  ;;  %v21_v32 = vld [vmem:[%s4834_s0] sm:$0xff]  ;;  %v22_v33 = vld [vmem:[%s4834_s0 + $0x8] sm:$0xff]  ;;  %v3691_v42 = vld [vmem:[%s4833_s1 + $0x170] sm:$0xff]  }
   0xe   :  { %3296 = vmatprep.subr.bf16.mxu1 %v3664_v13  ;;  %v2971_v34 = vcombine.low %v21_v32, %v21_v32  ;;  %v2972_v35 = vcombine.high %v21_v32, %v21_v32  ;;  %v2973_v36 = vcombine.low %v22_v33, %v22_v33  ;;  %v2974_v37 = vcombine.high %v22_v33, %v22_v33  ;;  %v3692_v43 = vld [vmem:[%s4833_s1 + $0x1f0] sm:$0xff]   ;;  %v3695_v46 = vld [vmem:[%s4833_s1 + $0x168] sm:$0xff]   ;;  %v3699_v50 = vld [vmem:[%s4833_s1 + $0x160] sm:$0xff]  }
   0xf   :  { %v3693_v44 = vld [vmem:[%s4833_s1 + $0x130] sm:$0xff]   ;;  %v3696_v47 = vld [vmem:[%s4833_s1 + $0x1e8] sm:$0xff]   ;;  %v3700_v51 = vld [vmem:[%s4833_s1 + $0x1e0] sm:$0xff]  }
  0x10   :  { %3275 = vmatpush3.bf16.msra.mxu0 %v3665_v14  ;;  %2236 = vmatprep.mubr.bf16.mxu0 %v2972_v35  ;;  %v3694_v45 = vld [vmem:[%s4833_s1 + $0x1b0] sm:$0xff]   ;;  %v3697_v48 = vld [vmem:[%s4833_s1 + $0x128] sm:$0xff]   ;;  %v3701_v52 = vld [vmem:[%s4833_s1 + $0x120] sm:$0xff]  }
  0x11   :  { %3297 = vmatpush3.bf16.msra.mxu1 %v3666_v15  ;;  %3276 = vmatprep.subr.bf16.mxu0 %v3667_v16  ;;  %v3698_v49 = vld [vmem:[%s4833_s1 + $0x1a8] sm:$0xff]   ;;  %v3702_v53 = vld [vmem:[%s4833_s1 + $0x1a0] sm:$0xff]   ;;  %v3703_v54 = vld [vmem:[%s4833_s1 + $0x158] sm:$0xff]  }
  0x12   :  { %3298 = vmatprep.subr.bf16.mxu1 %v3668_v17  ;;  %2276 = vmatprep.mubr.bf16.mxu1 %v2974_v37  ;;  %v3704_v55 = vld [vmem:[%s4833_s1 + $0x1d8] sm:$0xff]   ;;  %v3707_v58 = vld [vmem:[%s4833_s1 + $0x150] sm:$0xff]   ;;  %v3711_v62 = vld [vmem:[%s4833_s1 + $0x148] sm:$0xff]  }
  0x13   :  { %v3705_v56 = vld [vmem:[%s4833_s1 + $0x118] sm:$0xff]   ;;  %v3708_v59 = vld [vmem:[%s4833_s1 + $0x1d0] sm:$0xff]   ;;  %v3712_v63 = vld [vmem:[%s4833_s1 + $0x1c8] sm:$0xff]  }
  0x14   :  { %3277 = vmatpush3.bf16.msra.mxu0 %v3669_v18  ;;  %v3706_v57 = vld [vmem:[%s4833_s1 + $0x198] sm:$0xff]   ;;  %v3709_v60 = vld [vmem:[%s4833_s1 + $0x110] sm:$0xff]   ;;  %v3713_v0 = vld [vmem:[%s4833_s1 + $0x108] sm:$0xff]  }
  0x15   :  { %3299 = vmatpush3.bf16.msra.mxu1 %v3670_v19  ;;  %3278 = vmatprep.subr.bf16.mxu0 %v3671_v20  ;;  %v3710_v61 = vld [vmem:[%s4833_s1 + $0x190] sm:$0xff]   ;;  %v3714_v1 = vld [vmem:[%s4833_s1 + $0x188] sm:$0xff]   ;;  %v3715_v2 = vld [vmem:[%s4833_s1 + $0x140] sm:$0xff]  }
  0x16   :  { %3300 = vmatprep.subr.bf16.mxu1 %v3672_v21  ;;  %v3716_v3 = vld [vmem:[%s4833_s1 + $0x1c0] sm:$0xff]   ;;  %v23_v6 = vld [vmem:[%s4834_s0 + $0x10] sm:$0xff]  ;;  %v24_v9 = vld [vmem:[%s4834_s0 + $0x18] sm:$0xff] }
  0x17   :  { %v3717_v4 = vld [vmem:[%s4833_s1 + $0x100] sm:$0xff]   ;;  %v2975_v7 = vcombine.low %v23_v6, %v23_v6  ;;  %v2976_v8 = vcombine.high %v23_v6, %v23_v6  ;;  %v2977_v10 = vcombine.low %v24_v9, %v24_v9  ;;  %v2978_v11 = vcombine.high %v24_v9, %v24_v9  ;;  %v3723_v12 = vld [vmem:[%s4833_s1 + $0x278] sm:$0xff]   ;;  %v3727_v16 = vld [vmem:[%s4833_s1 + $0x270] sm:$0xff]  }
  0x18   :  { %3279 = vmatpush3.bf16.msra.mxu0 %v3673_v22  ;;  %v3718_v5 = vld [vmem:[%s4833_s1 + $0x180] sm:$0xff]   ;;  %v3724_v13 = vld [vmem:[%s4833_s1 + $0x2f8] sm:$0xff]   ;;  %v3728_v17 = vld [vmem:[%s4833_s1 + $0x2f0] sm:$0xff]  }
  0x19   :  { %3301 = vmatpush3.bf16.msra.mxu1 %v3674_v23  ;;  %3280 = vmatprep.subr.bf16.mxu0 %v3675_v24  ;;  %v3725_v14 = vld [vmem:[%s4833_s1 + $0x238] sm:$0xff]   ;;  %v3729_v18 = vld [vmem:[%s4833_s1 + $0x230] sm:$0xff]   ;;  %v3731_v20 = vld [vmem:[%s4833_s1 + $0x268] sm:$0xff]  }
  0x1a   :  { %3302 = vmatprep.subr.bf16.mxu1 %v3676_v25  ;;  %v3726_v15 = vld [vmem:[%s4833_s1 + $0x2b8] sm:$0xff]   ;;  %v3730_v19 = vld [vmem:[%s4833_s1 + $0x2b0] sm:$0xff]   ;;  %v3732_v21 = vld [vmem:[%s4833_s1 + $0x2e8] sm:$0xff]  }
  0x1b   :  { %v3733_v22 = vld [vmem:[%s4833_s1 + $0x228] sm:$0xff]   ;;  %v3735_v24 = vld [vmem:[%s4833_s1 + $0x260] sm:$0xff]   ;;  %v3743_v32 = vld [vmem:[%s4833_s1 + $0x250] sm:$0xff]  }
  0x1c   :  { %3281 = vmatpush3.bf16.msra.mxu0 %v3677_v26  ;;  %v3734_v23 = vld [vmem:[%s4833_s1 + $0x2a8] sm:$0xff]   ;;  %v3736_v25 = vld [vmem:[%s4833_s1 + $0x2e0] sm:$0xff]   ;;  %v3744_v33 = vld [vmem:[%s4833_s1 + $0x2d0] sm:$0xff]  }
  0x1d   :  { %3303 = vmatpush3.bf16.msra.mxu1 %v3678_v27  ;;  %3282 = vmatprep.subr.bf16.mxu0 %v3679_v28  ;;  %v3737_v26 = vld [vmem:[%s4833_s1 + $0x220] sm:$0xff]   ;;  %v3739_v28 = vld [vmem:[%s4833_s1 + $0x258] sm:$0xff]   ;;  %v3746_v35 = vld [vmem:[%s4833_s1 + $0x290] sm:$0xff]  }
  0x1e   :  { %3304 = vmatprep.subr.bf16.mxu1 %v3680_v29  ;;  %v3738_v27 = vld [vmem:[%s4833_s1 + $0x2a0] sm:$0xff]   ;;  %v3740_v29 = vld [vmem:[%s4833_s1 + $0x2d8] sm:$0xff]   ;;  %v3748_v37 = vld [vmem:[%s4833_s1 + $0x2c8] sm:$0xff]  }
  0x1f   :  { %v3779_v6 = vld [vmem:[%s4833_s1 + $0x350] sm:$0xff]  }
  0x20   :  { %3283 = vmatpush3.bf16.msra.mxu0 %v3681_v30  ;;  %v3741_v30 = vld [vmem:[%s4833_s1 + $0x218] sm:$0xff]   ;;  %v3782_v9 = vld [vmem:[%s4833_s1 + $0x390] sm:$0xff]  }
  0x21   :  { %3305 = vmatpush3.bf16.msra.mxu1 %v3682_v31  ;;  %3312 = vmatprep.subr.bf16.mxu0 %v3687_v38  ;;  %v3742_v31 = vld [vmem:[%s4833_s1 + $0x298] sm:$0xff]   ;;  %v3749_v38 = vld [vmem:[%s4833_s1 + $0x208] sm:$0xff]  }
  0x22   :  { %3334 = vmatprep.subr.bf16.mxu1 %v3688_v39  ;;  %v3750_v39 = vld [vmem:[%s4833_s1 + $0x288] sm:$0xff]  }
  0x23   :  { %2237 = vmatmul.mubr.bf16.vlgmr.msra.gmra.mxu0 %v2971_v34  ;;  %v3745_v34 = vld [vmem:[%s4833_s1 + $0x210] sm:$0xff]  }
  0x24   :  { %2277 = vmatmul.mubr.bf16.vlgmr.msra.gmra.mxu1 %v2973_v36  ;;  %3313 = vmatpush3.bf16.msra.mxu0 %v3689_v40  ;;  %v3747_v36 = vld [vmem:[%s4833_s1 + $0x248] sm:$0xff]   ;;  %v3751_v40 = vld [vmem:[%s4833_s1 + $0x240] sm:$0xff]  }
  0x25   :  { %3335 = vmatpush3.bf16.msra.mxu1 %v3690_v41  ;;  %3314 = vmatprep.subr.bf16.mxu0 %v3691_v42  ;;  %v3752_v41 = vld [vmem:[%s4833_s1 + $0x2c0] sm:$0xff]  }
  0x26   :  { %3336 = vmatprep.subr.bf16.mxu1 %v3692_v43  ;;  %2316 = vmatprep.mubr.bf16.mxu0 %v2976_v8  ;;  %v3753_v42 = vld [vmem:[%s4833_s1 + $0x200] sm:$0xff]   ;;  %v3781_v8 = vld [vmem:[%s4833_s1 + $0x310] sm:$0xff]  }
  0x27   :  { %2356 = vmatprep.mubr.bf16.mxu1 %v2978_v11  ;;  %v3754_v43 = vld [vmem:[%s4833_s1 + $0x280] sm:$0xff]   ;;  %v3784_v11 = vld [vmem:[%s4833_s1 + $0x3c8] sm:$0xff]  }
  0x28   :  { %3315 = vmatpush3.bf16.msra.mxu0 %v3693_v44  ;;  %v25_v44 = vld [vmem:[%s4834_s0 + $0x20] sm:$0xff] }
  0x29   :  { %3337 = vmatpush3.bf16.msra.mxu1 %v3694_v45  ;;  %3316 = vmatprep.subr.bf16.mxu0 %v3695_v46  ;;  %v26_v45 = vld [vmem:[%s4834_s0 + $0x28] sm:$0xff]  ;;  %v2979_v46 = vcombine.low %v25_v44, %v25_v44 }
  0x2a   :  { %3338 = vmatprep.subr.bf16.mxu1 %v3696_v47  ;;  %v2980_v47 = vcombine.high %v25_v44, %v25_v44  ;;  %v3815_v44 = vld [vmem:[%s4833_s1 + $0x450] sm:$0xff]  }
  0x2c   :  { %3317 = vmatpush3.bf16.msra.mxu0 %v3697_v48  ;;  %v2981_v48 = vcombine.low %v26_v45, %v26_v45 }
  0x2d   :  { %3339 = vmatpush3.bf16.msra.mxu1 %v3698_v49  ;;  %3318 = vmatprep.subr.bf16.mxu0 %v3699_v50  ;;  %v2982_v49 = vcombine.high %v26_v45, %v26_v45  ;;  %v3759_v50 = vld [vmem:[%s4833_s1 + $0x378] sm:$0xff]   ;;  %v3816_v45 = vld [vmem:[%s4833_s1 + $0x4d0] sm:$0xff]  }
  0x2e   :  { %3340 = vmatprep.subr.bf16.mxu1 %v3700_v51  ;;  %v3760_v51 = vld [vmem:[%s4833_s1 + $0x3f8] sm:$0xff]  }
  0x30   :  { %3319 = vmatpush3.bf16.msra.mxu0 %v3701_v52  ;;  %v3761_v52 = vld [vmem:[%s4833_s1 + $0x338] sm:$0xff]  }
  0x31   :  { %3341 = vmatpush3.bf16.msra.mxu1 %v3702_v53  ;;  %3320 = vmatprep.subr.bf16.mxu0 %v3703_v54  ;;  %v3762_v53 = vld [vmem:[%s4833_s1 + $0x3b8] sm:$0xff]   ;;  %v3763_v54 = vld [vmem:[%s4833_s1 + $0x370] sm:$0xff]  }
  0x32   :  { %3342 = vmatprep.subr.bf16.mxu1 %v3704_v55  ;;  %v3764_v55 = vld [vmem:[%s4833_s1 + $0x3f0] sm:$0xff]  }
  0x34   :  { %3321 = vmatpush3.bf16.msra.mxu0 %v3705_v56  ;;  %v3765_v56 = vld [vmem:[%s4833_s1 + $0x330] sm:$0xff]  }
  0x35   :  { %3343 = vmatpush3.bf16.msra.mxu1 %v3706_v57  ;;  %3322 = vmatprep.subr.bf16.mxu0 %v3707_v58  ;;  %v3766_v57 = vld [vmem:[%s4833_s1 + $0x3b0] sm:$0xff]   ;;  %v3767_v58 = vld [vmem:[%s4833_s1 + $0x368] sm:$0xff]  }
  0x36   :  { %3344 = vmatprep.subr.bf16.mxu1 %v3708_v59  ;;  %v3768_v59 = vld [vmem:[%s4833_s1 + $0x3e8] sm:$0xff]  }
  0x38   :  { %3323 = vmatpush3.bf16.msra.mxu0 %v3709_v60  ;;  %v3769_v60 = vld [vmem:[%s4833_s1 + $0x328] sm:$0xff]  }
  0x39   :  { %3345 = vmatpush3.bf16.msra.mxu1 %v3710_v61  ;;  %3324 = vmatprep.subr.bf16.mxu0 %v3711_v62  ;;  %v3770_v61 = vld [vmem:[%s4833_s1 + $0x3a8] sm:$0xff]   ;;  %v3771_v62 = vld [vmem:[%s4833_s1 + $0x360] sm:$0xff]  }
  0x3a   :  { %3346 = vmatprep.subr.bf16.mxu1 %v3712_v63  ;;  %v3772_v63 = vld [vmem:[%s4833_s1 + $0x3e0] sm:$0xff]  }
  0x3c   :  { %3325 = vmatpush3.bf16.msra.mxu0 %v3713_v0  ;;  %v3773_v0 = vld [vmem:[%s4833_s1 + $0x320] sm:$0xff]  }
  0x3d   :  { %3347 = vmatpush3.bf16.msra.mxu1 %v3714_v1  ;;  %3326 = vmatprep.subr.bf16.mxu0 %v3715_v2  ;;  %v3774_v1 = vld [vmem:[%s4833_s1 + $0x3a0] sm:$0xff]   ;;  %v3775_v2 = vld [vmem:[%s4833_s1 + $0x358] sm:$0xff]  }
  0x3e   :  { %3348 = vmatprep.subr.bf16.mxu1 %v3716_v3  ;;  %v3776_v3 = vld [vmem:[%s4833_s1 + $0x3d8] sm:$0xff]  }
  0x40   :  { %3327 = vmatpush3.bf16.msra.mxu0 %v3717_v4  ;;  %v3777_v4 = vld [vmem:[%s4833_s1 + $0x318] sm:$0xff]  }
  0x41   :  { %3349 = vmatpush3.bf16.msra.mxu1 %v3718_v5  ;;  %3356 = vmatprep.subr.bf16.mxu0 %v3723_v12  ;;  %v3778_v5 = vld [vmem:[%s4833_s1 + $0x398] sm:$0xff]   ;;  %v3785_v12 = vld [vmem:[%s4833_s1 + $0x308] sm:$0xff]  }
  0x42   :  { %3378 = vmatprep.subr.bf16.mxu1 %v3724_v13  ;;  %v3786_v13 = vld [vmem:[%s4833_s1 + $0x388] sm:$0xff]  }
  0x43   :  { %2317 = vmatmul.mubr.bf16.vlgmr.msra.gmra.mxu0 %v2975_v7  ;;  %v3780_v7 = vld [vmem:[%s4833_s1 + $0x3d0] sm:$0xff]  }
  0x44   :  { %2357 = vmatmul.mubr.bf16.vlgmr.msra.gmra.mxu1 %v2977_v10  ;;  %3357 = vmatpush3.bf16.msra.mxu0 %v3725_v14  ;;  %v3783_v10 = vld [vmem:[%s4833_s1 + $0x348] sm:$0xff]   ;;  %v3787_v14 = vld [vmem:[%s4833_s1 + $0x340] sm:$0xff]  }
  0x45   :  { %3379 = vmatpush3.bf16.msra.mxu1 %v3726_v15  ;;  %3358 = vmatprep.subr.bf16.mxu0 %v3727_v16  ;;  %v3788_v15 = vld [vmem:[%s4833_s1 + $0x3c0] sm:$0xff]  }
  0x46   :  { %3380 = vmatprep.subr.bf16.mxu1 %v3728_v17  ;;  %2396 = vmatprep.mubr.bf16.mxu0 %v2980_v47  ;;  %v3789_v16 = vld [vmem:[%s4833_s1 + $0x300] sm:$0xff]   ;;  %v3818_v47 = vld [vmem:[%s4833_s1 + $0x490] sm:$0xff]  }
  0x47   :  { %2436 = vmatprep.mubr.bf16.mxu1 %v2982_v49  ;;  %v3790_v17 = vld [vmem:[%s4833_s1 + $0x380] sm:$0xff]   ;;  %v3820_v49 = vld [vmem:[%s4833_s1 + $0x4c8] sm:$0xff]  }
  0x48   :  { %3359 = vmatpush3.bf16.msra.mxu0 %v3729_v18  ;;  %v27_v18 = vld [vmem:[%s4834_s0 + $0x30] sm:$0xff] }
  0x49   :  { %3381 = vmatpush3.bf16.msra.mxu1 %v3730_v19  ;;  %3360 = vmatprep.subr.bf16.mxu0 %v3731_v20  ;;  %v28_v19 = vld [vmem:[%s4834_s0 + $0x38] sm:$0xff]  ;;  %v2983_v20 = vcombine.low %v27_v18, %v27_v18 }
  0x4a   :  { %3382 = vmatprep.subr.bf16.mxu1 %v3732_v21  ;;  %v2984_v21 = vcombine.high %v27_v18, %v27_v18  ;;  %v3851_v18 = vld [vmem:[%s4833_s1 + $0x550] sm:$0xff]  }
  0x4c   :  { %3361 = vmatpush3.bf16.msra.mxu0 %v3733_v22  ;;  %v2985_v22 = vcombine.low %v28_v19, %v28_v19 }
  0x4d   :  { %3383 = vmatpush3.bf16.msra.mxu1 %v3734_v23  ;;  %3362 = vmatprep.subr.bf16.mxu0 %v3735_v24  ;;  %v3795_v23 = vld [vmem:[%s4833_s1 + $0x478] sm:$0xff]   ;;  %v2986_v24 = vcombine.high %v28_v19, %v28_v19  ;;  %v3852_v19 = vld [vmem:[%s4833_s1 + $0x5d0] sm:$0xff]  }
  0x4e   :  { %3384 = vmatprep.subr.bf16.mxu1 %v3736_v25  ;;  %v3796_v25 = vld [vmem:[%s4833_s1 + $0x4f8] sm:$0xff]  }
  0x50   :  { %3363 = vmatpush3.bf16.msra.mxu0 %v3737_v26  ;;  %v3797_v26 = vld [vmem:[%s4833_s1 + $0x438] sm:$0xff]  }
  0x51   :  { %3385 = vmatpush3.bf16.msra.mxu1 %v3738_v27  ;;  %3364 = vmatprep.subr.bf16.mxu0 %v3739_v28  ;;  %v3798_v27 = vld [vmem:[%s4833_s1 + $0x4b8] sm:$0xff]   ;;  %v3799_v28 = vld [vmem:[%s4833_s1 + $0x470] sm:$0xff]  }
  0x52   :  { %3386 = vmatprep.subr.bf16.mxu1 %v3740_v29  ;;  %v3800_v29 = vld [vmem:[%s4833_s1 + $0x4f0] sm:$0xff]  }
  0x54   :  { %3365 = vmatpush3.bf16.msra.mxu0 %v3741_v30  ;;  %v3801_v30 = vld [vmem:[%s4833_s1 + $0x430] sm:$0xff]  }
  0x55   :  { %3387 = vmatpush3.bf16.msra.mxu1 %v3742_v31  ;;  %3366 = vmatprep.subr.bf16.mxu0 %v3743_v32  ;;  %v3802_v31 = vld [vmem:[%s4833_s1 + $0x4b0] sm:$0xff]   ;;  %v3803_v32 = vld [vmem:[%s4833_s1 + $0x468] sm:$0xff]  }
  0x56   :  { %3388 = vmatprep.subr.bf16.mxu1 %v3744_v33  ;;  %v3804_v33 = vld [vmem:[%s4833_s1 + $0x4e8] sm:$0xff]  }
  0x58   :  { %3367 = vmatpush3.bf16.msra.mxu0 %v3745_v34  ;;  %v3805_v34 = vld [vmem:[%s4833_s1 + $0x428] sm:$0xff]  }
  0x59   :  { %3389 = vmatpush3.bf16.msra.mxu1 %v3746_v35  ;;  %3368 = vmatprep.subr.bf16.mxu0 %v3747_v36  ;;  %v3806_v35 = vld [vmem:[%s4833_s1 + $0x4a8] sm:$0xff]   ;;  %v3807_v36 = vld [vmem:[%s4833_s1 + $0x460] sm:$0xff]  }
  0x5a   :  { %3390 = vmatprep.subr.bf16.mxu1 %v3748_v37  ;;  %v3808_v37 = vld [vmem:[%s4833_s1 + $0x4e0] sm:$0xff]  }
  0x5c   :  { %3369 = vmatpush3.bf16.msra.mxu0 %v3749_v38  ;;  %v3809_v38 = vld [vmem:[%s4833_s1 + $0x420] sm:$0xff]  }
  0x5d   :  { %3391 = vmatpush3.bf16.msra.mxu1 %v3750_v39  ;;  %3370 = vmatprep.subr.bf16.mxu0 %v3751_v40  ;;  %v3810_v39 = vld [vmem:[%s4833_s1 + $0x4a0] sm:$0xff]   ;;  %v3811_v40 = vld [vmem:[%s4833_s1 + $0x458] sm:$0xff]  }
  0x5e   :  { %3392 = vmatprep.subr.bf16.mxu1 %v3752_v41  ;;  %v3812_v41 = vld [vmem:[%s4833_s1 + $0x4d8] sm:$0xff]  }
  0x60   :  { %3371 = vmatpush3.bf16.msra.mxu0 %v3753_v42  ;;  %v3813_v42 = vld [vmem:[%s4833_s1 + $0x418] sm:$0xff]  }
  0x61   :  { %3393 = vmatpush3.bf16.msra.mxu1 %v3754_v43  ;;  %3400 = vmatprep.subr.bf16.mxu0 %v3759_v50  ;;  %v3814_v43 = vld [vmem:[%s4833_s1 + $0x498] sm:$0xff]   ;;  %v3821_v50 = vld [vmem:[%s4833_s1 + $0x408] sm:$0xff]  }
  0x62   :  { %3422 = vmatprep.subr.bf16.mxu1 %v3760_v51  ;;  %v3822_v51 = vld [vmem:[%s4833_s1 + $0x488] sm:$0xff]  }
  0x63   :  { %2397 = vmatmul.mubr.bf16.vlgmr.msra.gmra.mxu0 %v2979_v46  ;;  %v3817_v46 = vld [vmem:[%s4833_s1 + $0x410] sm:$0xff]  }
  0x64   :  { %2437 = vmatmul.mubr.bf16.vlgmr.msra.gmra.mxu1 %v2981_v48  ;;  %3401 = vmatpush3.bf16.msra.mxu0 %v3761_v52  ;;  %v3819_v48 = vld [vmem:[%s4833_s1 + $0x448] sm:$0xff]   ;;  %v3823_v52 = vld [vmem:[%s4833_s1 + $0x440] sm:$0xff]  }
  0x65   :  { %3423 = vmatpush3.bf16.msra.mxu1 %v3762_v53  ;;  %3402 = vmatprep.subr.bf16.mxu0 %v3763_v54  ;;  %v3824_v53 = vld [vmem:[%s4833_s1 + $0x4c0] sm:$0xff]  }
  0x66   :  { %3424 = vmatprep.subr.bf16.mxu1 %v3764_v55  ;;  %2476 = vmatprep.mubr.bf16.mxu0 %v2984_v21  ;;  %v3825_v54 = vld [vmem:[%s4833_s1 + $0x400] sm:$0xff]   ;;  %v3854_v21 = vld [vmem:[%s4833_s1 + $0x590] sm:$0xff]  }
  0x67   :  { %2516 = vmatprep.mubr.bf16.mxu1 %v2986_v24  ;;  %v3826_v55 = vld [vmem:[%s4833_s1 + $0x480] sm:$0xff]   ;;  %v3857_v24 = vld [vmem:[%s4833_s1 + $0x508] sm:$0xff]  }
  0x68   :  { %3403 = vmatpush3.bf16.msra.mxu0 %v3765_v56  ;;  %v29_v56 = vld [vmem:[%s4834_s0 + $0x40] sm:$0xff] }
  0x69   :  { %3425 = vmatpush3.bf16.msra.mxu1 %v3766_v57  ;;  %3404 = vmatprep.subr.bf16.mxu0 %v3767_v58  ;;  %v2987_v57 = vcombine.low %v29_v56, %v29_v56  ;;  %v2988_v58 = vcombine.high %v29_v56, %v29_v56  ;;  %v3887_v56 = vld [vmem:[%s4833_s1 + $0x650] sm:$0xff]  }
  0x6a   :  { %3426 = vmatprep.subr.bf16.mxu1 %v3768_v59  ;;  %v30_v59 = vld [vmem:[%s4834_s0 + $0x48] sm:$0xff] }
  0x6c   :  { %3405 = vmatpush3.bf16.msra.mxu0 %v3769_v60  ;;  %v2989_v60 = vcombine.low %v30_v59, %v30_v59 }
  0x6d   :  { %3427 = vmatpush3.bf16.msra.mxu1 %v3770_v61  ;;  %3406 = vmatprep.subr.bf16.mxu0 %v3771_v62  ;;  %v2990_v61 = vcombine.high %v30_v59, %v30_v59  ;;  %v3831_v62 = vld [vmem:[%s4833_s1 + $0x578] sm:$0xff]   ;;  %v3890_v59 = vld [vmem:[%s4833_s1 + $0x690] sm:$0xff]  }
  0x6e   :  { %3428 = vmatprep.subr.bf16.mxu1 %v3772_v63  ;;  %v3832_v63 = vld [vmem:[%s4833_s1 + $0x5f8] sm:$0xff]  }
  0x70   :  { %3407 = vmatpush3.bf16.msra.mxu0 %v3773_v0  ;;  %v3833_v0 = vld [vmem:[%s4833_s1 + $0x538] sm:$0xff]  }
  0x71   :  { %3429 = vmatpush3.bf16.msra.mxu1 %v3774_v1  ;;  %3408 = vmatprep.subr.bf16.mxu0 %v3775_v2  ;;  %v3834_v1 = vld [vmem:[%s4833_s1 + $0x5b8] sm:$0xff]   ;;  %v3835_v2 = vld [vmem:[%s4833_s1 + $0x570] sm:$0xff]  }
  0x72   :  { %3430 = vmatprep.subr.bf16.mxu1 %v3776_v3  ;;  %v3836_v3 = vld [vmem:[%s4833_s1 + $0x5f0] sm:$0xff]  }
  0x74   :  { %3409 = vmatpush3.bf16.msra.mxu0 %v3777_v4  ;;  %v3837_v4 = vld [vmem:[%s4833_s1 + $0x530] sm:$0xff]  }
  0x75   :  { %3431 = vmatpush3.bf16.msra.mxu1 %v3778_v5  ;;  %3410 = vmatprep.subr.bf16.mxu0 %v3779_v6  ;;  %v3838_v5 = vld [vmem:[%s4833_s1 + $0x5b0] sm:$0xff]   ;;  %v3839_v6 = vld [vmem:[%s4833_s1 + $0x568] sm:$0xff]  }
  0x76   :  { %3432 = vmatprep.subr.bf16.mxu1 %v3780_v7  ;;  %v3840_v7 = vld [vmem:[%s4833_s1 + $0x5e8] sm:$0xff]  }
  0x78   :  { %3411 = vmatpush3.bf16.msra.mxu0 %v3781_v8  ;;  %v3841_v8 = vld [vmem:[%s4833_s1 + $0x528] sm:$0xff]  }
  0x79   :  { %3433 = vmatpush3.bf16.msra.mxu1 %v3782_v9  ;;  %3412 = vmatprep.subr.bf16.mxu0 %v3783_v10  ;;  %v3842_v9 = vld [vmem:[%s4833_s1 + $0x5a8] sm:$0xff]   ;;  %v3843_v10 = vld [vmem:[%s4833_s1 + $0x560] sm:$0xff]  }
  0x7a   :  { %3434 = vmatprep.subr.bf16.mxu1 %v3784_v11  ;;  %v3844_v11 = vld [vmem:[%s4833_s1 + $0x5e0] sm:$0xff]  }
  0x7c   :  { %3413 = vmatpush3.bf16.msra.mxu0 %v3785_v12  ;;  %v3845_v12 = vld [vmem:[%s4833_s1 + $0x520] sm:$0xff]  }
  0x7d   :  { %3435 = vmatpush3.bf16.msra.mxu1 %v3786_v13  ;;  %3414 = vmatprep.subr.bf16.mxu0 %v3787_v14  ;;  %v3846_v13 = vld [vmem:[%s4833_s1 + $0x5a0] sm:$0xff]   ;;  %v3847_v14 = vld [vmem:[%s4833_s1 + $0x558] sm:$0xff]  }
  0x7e   :  { %3436 = vmatprep.subr.bf16.mxu1 %v3788_v15  ;;  %v3848_v15 = vld [vmem:[%s4833_s1 + $0x5d8] sm:$0xff]  }
  0x80   :  { %3415 = vmatpush3.bf16.msra.mxu0 %v3789_v16  ;;  %v3849_v16 = vld [vmem:[%s4833_s1 + $0x518] sm:$0xff]  }
  0x81   :  { %3437 = vmatpush3.bf16.msra.mxu1 %v3790_v17  ;;  %3444 = vmatprep.subr.bf16.mxu0 %v3795_v23  ;;  %v3850_v17 = vld [vmem:[%s4833_s1 + $0x598] sm:$0xff]   ;;  %v3856_v23 = vld [vmem:[%s4833_s1 + $0x5c8] sm:$0xff]  }
  0x82   :  { %3466 = vmatprep.subr.bf16.mxu1 %v3796_v25  ;;  %v3858_v25 = vld [vmem:[%s4833_s1 + $0x588] sm:$0xff]  }
  0x83   :  { %2477 = vmatmul.mubr.bf16.vlgmr.msra.gmra.mxu0 %v2983_v20  ;;  %v3853_v20 = vld [vmem:[%s4833_s1 + $0x510] sm:$0xff]  }
  0x84   :  { %2517 = vmatmul.mubr.bf16.vlgmr.msra.gmra.mxu1 %v2985_v22  ;;  %3445 = vmatpush3.bf16.msra.mxu0 %v3797_v26  ;;  %v3855_v22 = vld [vmem:[%s4833_s1 + $0x548] sm:$0xff]   ;;  %v3859_v26 = vld [vmem:[%s4833_s1 + $0x540] sm:$0xff]  }
  0x85   :  { %3467 = vmatpush3.bf16.msra.mxu1 %v3798_v27  ;;  %3446 = vmatprep.subr.bf16.mxu0 %v3799_v28  ;;  %v3860_v27 = vld [vmem:[%s4833_s1 + $0x5c0] sm:$0xff]  }
  0x86   :  { %3468 = vmatprep.subr.bf16.mxu1 %v3800_v29  ;;  %2556 = vmatprep.mubr.bf16.mxu0 %v2988_v58  ;;  %v3861_v28 = vld [vmem:[%s4833_s1 + $0x500] sm:$0xff]   ;;  %v3889_v58 = vld [vmem:[%s4833_s1 + $0x610] sm:$0xff]  }
  0x87   :  { %2596 = vmatprep.mubr.bf16.mxu1 %v2990_v61  ;;  %v3862_v29 = vld [vmem:[%s4833_s1 + $0x580] sm:$0xff]   ;;  %v3892_v61 = vld [vmem:[%s4833_s1 + $0x6c8] sm:$0xff]  }
  0x88   :  { %3447 = vmatpush3.bf16.msra.mxu0 %v3801_v30  ;;  %v31_v30 = vld [vmem:[%s4834_s0 + $0x50] sm:$0xff] }
  0x89   :  { %3469 = vmatpush3.bf16.msra.mxu1 %v3802_v31  ;;  %3448 = vmatprep.subr.bf16.mxu0 %v3803_v32  ;;  %v32_v31 = vld [vmem:[%s4834_s0 + $0x58] sm:$0xff]  ;;  %v2991_v32 = vcombine.low %v31_v30, %v31_v30 }
  0x8a   :  { %3470 = vmatprep.subr.bf16.mxu1 %v3804_v33  ;;  %v2992_v33 = vcombine.high %v31_v30, %v31_v30  ;;  %v3910_v30 = vld [vmem:[%s4833_s1 + $0x7b0] sm:$0xff]  }
  0x8c   :  { %3449 = vmatpush3.bf16.msra.mxu0 %v3805_v34  ;;  %v2993_v34 = vcombine.low %v32_v31, %v32_v31 }
  0x8d   :  { %3471 = vmatpush3.bf16.msra.mxu1 %v3806_v35  ;;  %3450 = vmatprep.subr.bf16.mxu0 %v3807_v36  ;;  %v2994_v35 = vcombine.high %v32_v31, %v32_v31  ;;  %v3867_v36 = vld [vmem:[%s4833_s1 + $0x678] sm:$0xff]   ;;  %v3911_v31 = vld [vmem:[%s4833_s1 + $0x768] sm:$0xff]  }
  0x8e   :  { %3472 = vmatprep.subr.bf16.mxu1 %v3808_v37  ;;  %v3868_v37 = vld [vmem:[%s4833_s1 + $0x6f8] sm:$0xff]  }
  0x90   :  { %3451 = vmatpush3.bf16.msra.mxu0 %v3809_v38  ;;  %v3869_v38 = vld [vmem:[%s4833_s1 + $0x638] sm:$0xff]  }
  0x91   :  { %3473 = vmatpush3.bf16.msra.mxu1 %v3810_v39  ;;  %3452 = vmatprep.subr.bf16.mxu0 %v3811_v40  ;;  %v3870_v39 = vld [vmem:[%s4833_s1 + $0x6b8] sm:$0xff]   ;;  %v3871_v40 = vld [vmem:[%s4833_s1 + $0x670] sm:$0xff]  }
  0x92   :  { %3474 = vmatprep.subr.bf16.mxu1 %v3812_v41  ;;  %v3872_v41 = vld [vmem:[%s4833_s1 + $0x6f0] sm:$0xff]  }
  0x94   :  { %3453 = vmatpush3.bf16.msra.mxu0 %v3813_v42  ;;  %v3873_v42 = vld [vmem:[%s4833_s1 + $0x630] sm:$0xff]  }
  0x95   :  { %3475 = vmatpush3.bf16.msra.mxu1 %v3814_v43  ;;  %3454 = vmatprep.subr.bf16.mxu0 %v3815_v44  ;;  %v3874_v43 = vld [vmem:[%s4833_s1 + $0x6b0] sm:$0xff]   ;;  %v3875_v44 = vld [vmem:[%s4833_s1 + $0x668] sm:$0xff]  }
  0x96   :  { %3476 = vmatprep.subr.bf16.mxu1 %v3816_v45  ;;  %v3876_v45 = vld [vmem:[%s4833_s1 + $0x6e8] sm:$0xff]  }
  0x98   :  { %3455 = vmatpush3.bf16.msra.mxu0 %v3817_v46  ;;  %v3877_v46 = vld [vmem:[%s4833_s1 + $0x628] sm:$0xff]  }
  0x99   :  { %3477 = vmatpush3.bf16.msra.mxu1 %v3818_v47  ;;  %3456 = vmatprep.subr.bf16.mxu0 %v3819_v48  ;;  %v3878_v47 = vld [vmem:[%s4833_s1 + $0x6a8] sm:$0xff]   ;;  %v3879_v48 = vld [vmem:[%s4833_s1 + $0x660] sm:$0xff]  }
  0x9a   :  { %3478 = vmatprep.subr.bf16.mxu1 %v3820_v49  ;;  %v3880_v49 = vld [vmem:[%s4833_s1 + $0x6e0] sm:$0xff]  }
  0x9c   :  { %3457 = vmatpush3.bf16.msra.mxu0 %v3821_v50  ;;  %v3881_v50 = vld [vmem:[%s4833_s1 + $0x620] sm:$0xff]  }
  0x9d   :  { %3479 = vmatpush3.bf16.msra.mxu1 %v3822_v51  ;;  %3458 = vmatprep.subr.bf16.mxu0 %v3823_v52  ;;  %v3882_v51 = vld [vmem:[%s4833_s1 + $0x6a0] sm:$0xff]   ;;  %v3883_v52 = vld [vmem:[%s4833_s1 + $0x658] sm:$0xff]  }
  0x9e   :  { %3480 = vmatprep.subr.bf16.mxu1 %v3824_v53  ;;  %v3884_v53 = vld [vmem:[%s4833_s1 + $0x6d8] sm:$0xff]  }
  0xa0   :  { %3459 = vmatpush3.bf16.msra.mxu0 %v3825_v54  ;;  %v3885_v54 = vld [vmem:[%s4833_s1 + $0x618] sm:$0xff]  }
  0xa1   :  { %3481 = vmatpush3.bf16.msra.mxu1 %v3826_v55  ;;  %3488 = vmatprep.subr.bf16.mxu0 %v3831_v62  ;;  %v3886_v55 = vld [vmem:[%s4833_s1 + $0x698] sm:$0xff]   ;;  %v3893_v62 = vld [vmem:[%s4833_s1 + $0x608] sm:$0xff]  }
  0xa2   :  { %3510 = vmatprep.subr.bf16.mxu1 %v3832_v63  ;;  %v3894_v63 = vld [vmem:[%s4833_s1 + $0x688] sm:$0xff]  }
  0xa3   :  { %2557 = vmatmul.mubr.bf16.vlgmr.msra.gmra.mxu0 %v2987_v57  ;;  %v3888_v57 = vld [vmem:[%s4833_s1 + $0x6d0] sm:$0xff]  }
  0xa4   :  { %2597 = vmatmul.mubr.bf16.vlgmr.msra.gmra.mxu1 %v2989_v60  ;;  %3489 = vmatpush3.bf16.msra.mxu0 %v3833_v0  ;;  %v3891_v60 = vld [vmem:[%s4833_s1 + $0x648] sm:$0xff]   ;;  %v3895_v0 = vld [vmem:[%s4833_s1 + $0x640] sm:$0xff]  }
  0xa5   :  { %3511 = vmatpush3.bf16.msra.mxu1 %v3834_v1  ;;  %3490 = vmatprep.subr.bf16.mxu0 %v3835_v2  ;;  %v3896_v1 = vld [vmem:[%s4833_s1 + $0x6c0] sm:$0xff]  }
  0xa6   :  { %3512 = vmatprep.subr.bf16.mxu1 %v3836_v3  ;;  %2636 = vmatprep.mubr.bf16.mxu0 %v2992_v33  ;;  %v3897_v2 = vld [vmem:[%s4833_s1 + $0x600] sm:$0xff]   ;;  %v3913_v33 = vld [vmem:[%s4833_s1 + $0x728] sm:$0xff]  }
  0xa7   :  { %2676 = vmatprep.mubr.bf16.mxu1 %v2994_v35  ;;  %v3898_v3 = vld [vmem:[%s4833_s1 + $0x680] sm:$0xff]  }
  0xa8   :  { %3491 = vmatpush3.bf16.msra.mxu0 %v3837_v4  ;;  %v33_v4 = vld [vmem:[%s4834_s0 + $0x60] sm:$0xff] }
  0xa9   :  { %3513 = vmatpush3.bf16.msra.mxu1 %v3838_v5  ;;  %3492 = vmatprep.subr.bf16.mxu0 %v3839_v6  ;;  %v34_v5 = vld [vmem:[%s4834_s0 + $0x68] sm:$0xff]  ;;  %v3915_v35 = vld [vmem:[%s4833_s1 + $0x760] sm:$0xff]  }
  0xaa   :  { %3514 = vmatprep.subr.bf16.mxu1 %v3840_v7 }
  0xac   :  { %3493 = vmatpush3.bf16.msra.mxu0 %v3841_v8  ;;  %v2995_v8 = vcombine.low %v33_v4, %v33_v4 }
  0xad   :  { %3515 = vmatpush3.bf16.msra.mxu1 %v3842_v9  ;;  %3494 = vmatprep.subr.bf16.mxu0 %v3843_v10  ;;  %v2996_v9 = vcombine.high %v33_v4, %v33_v4  ;;  %v2997_v10 = vcombine.low %v34_v5, %v34_v5 }
  0xae   :  { %3516 = vmatprep.subr.bf16.mxu1 %v3844_v11  ;;  %v3903_v11 = vld [vmem:[%s4833_s1 + $0x778] sm:$0xff]  }
  0xb0   :  { %3495 = vmatpush3.bf16.msra.mxu0 %v3845_v12  ;;  %v2998_v12 = vcombine.high %v34_v5, %v34_v5 }
  0xb1   :  { %3517 = vmatpush3.bf16.msra.mxu1 %v3846_v13  ;;  %3496 = vmatprep.subr.bf16.mxu0 %v3847_v14  ;;  %v3904_v13 = vld [vmem:[%s4833_s1 + $0x7f8] sm:$0xff]  }
  0xb2   :  { %3518 = vmatprep.subr.bf16.mxu1 %v3848_v15 }
  0xb4   :  { %3497 = vmatpush3.bf16.msra.mxu0 %v3849_v16  ;;  %v3905_v16 = vld [vmem:[%s4833_s1 + $0x738] sm:$0xff]  }
  0xb5   :  { %3519 = vmatpush3.bf16.msra.mxu1 %v3850_v17  ;;  %3498 = vmatprep.subr.bf16.mxu0 %v3851_v18 }
  0xb6   :  { %3520 = vmatprep.subr.bf16.mxu1 %v3852_v19  ;;  %v3906_v19 = vld [vmem:[%s4833_s1 + $0x7b8] sm:$0xff]  }
  0xb8   :  { %3499 = vmatpush3.bf16.msra.mxu0 %v3853_v20  ;;  %v2970_v20 = vld [vmem:[%s4835_s2] ss:$0 sm:$0xff] }
  0xb9   :  { %3521 = vmatpush3.bf16.msra.mxu1 %v3854_v21  ;;  %3500 = vmatprep.subr.bf16.mxu0 %v3855_v22 }
  0xba   :  { %3522 = vmatprep.subr.bf16.mxu1 %v3856_v23 }
  0xbc   :  { %3501 = vmatpush3.bf16.msra.mxu0 %v3857_v24  ;;  %v3907_v24 = vld [vmem:[%s4833_s1 + $0x770] sm:$0xff]  }
  0xbd   :  { %3523 = vmatpush3.bf16.msra.mxu1 %v3858_v25  ;;  %3502 = vmatprep.subr.bf16.mxu0 %v3859_v26  ;;  %v3908_v25 = vld [vmem:[%s4833_s1 + $0x7f0] sm:$0xff]  }
  0xbe   :  { %3524 = vmatprep.subr.bf16.mxu1 %v3860_v27 }
  0xc0   :  { %3503 = vmatpush3.bf16.msra.mxu0 %v3861_v28 }
  0xc1   :  { %3525 = vmatpush3.bf16.msra.mxu1 %v3862_v29  ;;  %3532 = vmatprep.subr.bf16.mxu0 %v3867_v36  ;;  %v3909_v29 = vld [vmem:[%s4833_s1 + $0x730] sm:$0xff]   ;;  %v3916_v36 = vld [vmem:[%s4833_s1 + $0x7e0] sm:$0xff]  }
  0xc2   :  { %3554 = vmatprep.subr.bf16.mxu1 %v3868_v37  ;;  %v3917_v37 = vld [vmem:[%s4833_s1 + $0x720] sm:$0xff]  }
  0xc3   :  { %2637 = vmatmul.mubr.bf16.vlgmr.msra.gmra.mxu0 %v2991_v32  ;;  %v3912_v32 = vld [vmem:[%s4833_s1 + $0x7e8] sm:$0xff]  }
  0xc4   :  { %2677 = vmatmul.mubr.bf16.vlgmr.msra.gmra.mxu1 %v2993_v34  ;;  %3533 = vmatpush3.bf16.msra.mxu0 %v3869_v38  ;;  %v3914_v34 = vld [vmem:[%s4833_s1 + $0x7a8] sm:$0xff]   ;;  %v3918_v38 = vld [vmem:[%s4833_s1 + $0x7a0] sm:$0xff]  }
  0xc5   :  { %3555 = vmatpush3.bf16.msra.mxu1 %v3870_v39  ;;  %3534 = vmatprep.subr.bf16.mxu0 %v3871_v40  ;;  %v3919_v39 = vld [vmem:[%s4833_s1 + $0x758] sm:$0xff]  }
  0xc6   :  { %3556 = vmatprep.subr.bf16.mxu1 %v3872_v41  ;;  %2716 = vmatprep.mubr.bf16.mxu0 %v2996_v9  ;;  %v3920_v40 = vld [vmem:[%s4833_s1 + $0x7d8] sm:$0xff]  }
  0xc7   :  { %2756 = vmatprep.mubr.bf16.mxu1 %v2998_v12  ;;  %v3921_v41 = vld [vmem:[%s4833_s1 + $0x718] sm:$0xff]  }
  0xc8   :  { %3535 = vmatpush3.bf16.msra.mxu0 %v3873_v42  ;;  %v3922_v42 = vld [vmem:[%s4833_s1 + $0x798] sm:$0xff]  }
  0xc9   :  { %3557 = vmatpush3.bf16.msra.mxu1 %v3874_v43  ;;  %3536 = vmatprep.subr.bf16.mxu0 %v3875_v44  ;;  %v3923_v43 = vld [vmem:[%s4833_s1 + $0x750] sm:$0xff]  }
  0xca   :  { %3558 = vmatprep.subr.bf16.mxu1 %v3876_v45  ;;  %v3924_v44 = vld [vmem:[%s4833_s1 + $0x7d0] sm:$0xff]  }
  0xcb   :  { %v3925_v45 = vld [vmem:[%s4833_s1 + $0x710] sm:$0xff]  }
  0xcc   :  { %3537 = vmatpush3.bf16.msra.mxu0 %v3877_v46  ;;  %v3926_v46 = vld [vmem:[%s4833_s1 + $0x790] sm:$0xff]  }
  0xcd   :  { %3559 = vmatpush3.bf16.msra.mxu1 %v3878_v47  ;;  %3538 = vmatprep.subr.bf16.mxu0 %v3879_v48  ;;  %v3927_v47 = vld [vmem:[%s4833_s1 + $0x748] sm:$0xff]  }
  0xce   :  { %3560 = vmatprep.subr.bf16.mxu1 %v3880_v49  ;;  %v3928_v48 = vld [vmem:[%s4833_s1 + $0x7c8] sm:$0xff]  }
  0xcf   :  { %v3929_v49 = vld [vmem:[%s4833_s1 + $0x708] sm:$0xff]  }
  0xd0   :  { %3539 = vmatpush3.bf16.msra.mxu0 %v3881_v50  ;;  %v3930_v50 = vld [vmem:[%s4833_s1 + $0x788] sm:$0xff]  }
  0xd1   :  { %3561 = vmatpush3.bf16.msra.mxu1 %v3882_v51  ;;  %3540 = vmatprep.subr.bf16.mxu0 %v3883_v52  ;;  %v3931_v51 = vld [vmem:[%s4833_s1 + $0x740] sm:$0xff]  }
  0xd2   :  { %3562 = vmatprep.subr.bf16.mxu1 %v3884_v53  ;;  %v3932_v52 = vld [vmem:[%s4833_s1 + $0x7c0] sm:$0xff]  }
  0xd3   :  { %v3933_v53 = vld [vmem:[%s4833_s1 + $0x700] sm:$0xff]  }
  0xd4   :  { %3541 = vmatpush3.bf16.msra.mxu0 %v3885_v54  ;;  %v3934_v54 = vld [vmem:[%s4833_s1 + $0x780] sm:$0xff]  }
  0xd5   :  { %3563 = vmatpush3.bf16.msra.mxu1 %v3886_v55  ;;  %3542 = vmatprep.subr.bf16.mxu0 %v3887_v56  ;;  %v35_v55 = vld [vmem:[%s4834_s0 + $0x70] sm:$0xff]  ;;  %v36_v56 = vld [vmem:[%s4834_s0 + $0x78] sm:$0xff] }
  0xd6   :  { %3564 = vmatprep.subr.bf16.mxu1 %v3888_v57 }
  0xd8   :  { %3543 = vmatpush3.bf16.msra.mxu0 %v3889_v58 }
  0xd9   :  { %3565 = vmatpush3.bf16.msra.mxu1 %v3890_v59  ;;  %3544 = vmatprep.subr.bf16.mxu0 %v3891_v60  ;;  %v2999_v59 = vcombine.low %v35_v55, %v35_v55  ;;  %v3000_v60 = vcombine.high %v35_v55, %v35_v55 }
  0xda   :  { %3566 = vmatprep.subr.bf16.mxu1 %v3892_v61  ;;  %v3001_v61 = vcombine.low %v36_v56, %v36_v56 }
  0xdc   :  { %3545 = vmatpush3.bf16.msra.mxu0 %v3893_v62  ;;  %v3002_v62 = vcombine.high %v36_v56, %v36_v56 }
  0xdd   :  { %3567 = vmatpush3.bf16.msra.mxu1 %v3894_v63  ;;  %3546 = vmatprep.subr.bf16.mxu0 %v3895_v0 }
  0xde   :  { %3568 = vmatprep.subr.bf16.mxu1 %v3896_v1 }
  0xe0   :  { %3547 = vmatpush3.bf16.msra.mxu0 %v3897_v2 }
  0xe1   :  { %3569 = vmatpush3.bf16.msra.mxu1 %v3898_v3  ;;  %3576 = vmatprep.subr.bf16.mxu0 %v3903_v11 }
  0xe2   :  { %3598 = vmatprep.subr.bf16.mxu1 %v3904_v13 }
  0xe3   :  { %v3284_v6 = vpop.f32.mrf.mxu0  ;;  %2717 = vmatmul.mubr.bf16.vlgmr.msra.gmra.mxu0 %v2995_v8 }
  0xe4   :  { %v3306_v7 = vpop.f32.mrf.mxu1  ;;  %2757 = vmatmul.mubr.bf16.vlgmr.msra.gmra.mxu1 %v2997_v10  ;;  %3577 = vmatpush3.bf16.msra.mxu0 %v3905_v16 }
  0xe5   :  { %v3285_v14 = vpop.f32.mrf.mxu0  ;;  %3599 = vmatpush3.bf16.msra.mxu1 %v3906_v19  ;;  %3578 = vmatprep.subr.bf16.mxu0 %v3907_v24  ;;  %v3941_v24 = vld [vmem:[%s4836_s3 + $0x28] sm:$0xff]  }
  0xe6   :  { %v3307_v15 = vpop.f32.mrf.mxu1  ;;  %v3286_v17 = vadd.f32 %v3285_v14, %v3284_v6  ;;  %3600 = vmatprep.subr.bf16.mxu1 %v3908_v25  ;;  %2796 = vmatprep.mubr.bf16.mxu0 %v3000_v60  ;;  %v3942_v25 = vld [vmem:[%s4836_s3 + $0x20] sm:$0xff]  }
  0xe7   :  { %v3308_v18 = vadd.f32 %v3307_v15, %v3306_v7  ;;  %v3287_v21 = vpop.f32.mrf.mxu0  ;;  %2836 = vmatprep.mubr.bf16.mxu1 %v3002_v62 }
  0xe8   :  { %v3309_v22 = vpop.f32.mrf.mxu1  ;;  %v2239_v23 = vadd.f32 %v3286_v17, %v2970_v20  ;;  %3579 = vmatpush3.bf16.msra.mxu0 %v3909_v29  ;;  %v3949_v21 = vmov 0.0  }
  0xe9   :  { %v3288_v26 = vpop.f32.mrf.mxu0  ;;  %3601 = vmatpush3.bf16.msra.mxu1 %v3910_v30  ;;  %3580 = vmatprep.subr.bf16.mxu0 %v3911_v31  ;;  %v3939_v22 = vld [vmem:[%s4836_s3 + $0x38] sm:$0xff]  }
  0xea   :  { %v3310_v27 = vpop.f32.mrf.mxu1  ;;  %v4716_v28 = vadd.f32 %v3308_v18, %v2239_v23  ;;  %3602 = vmatprep.subr.bf16.mxu1 %v3912_v32  ;;  %v3940_v23 = vld [vmem:[%s4836_s3 + $0x30] sm:$0xff]   ;;  %v3943_v26 = vld [vmem:[%s4836_s3 + $0x18] sm:$0xff]  }
  0xec   :  { %3581 = vmatpush3.bf16.msra.mxu0 %v3913_v33 }
  0xed   :  { %3603 = vmatpush3.bf16.msra.mxu1 %v3914_v34  ;;  %3582 = vmatprep.subr.bf16.mxu0 %v3915_v35 }
  0xee   :  { %3604 = vmatprep.subr.bf16.mxu1 %v3916_v36  ;;  %v3944_v36 = vld [vmem:[%s4836_s3 + $0x10] sm:$0xff]  }
  0xf0   :  { %3583 = vmatpush3.bf16.msra.mxu0 %v3917_v37 }
  0xf1   :  { %3605 = vmatpush3.bf16.msra.mxu1 %v3918_v38  ;;  %3584 = vmatprep.subr.bf16.mxu0 %v3919_v39 }
  0xf2   :  { %3606 = vmatprep.subr.bf16.mxu1 %v3920_v40  ;;  %v3945_v40 = vld [vmem:[%s4836_s3 + $0x8] sm:$0xff]  }
  0xf4   :  { %3585 = vmatpush3.bf16.msra.mxu0 %v3921_v41  ;;  %v3946_v41 = vld [vmem:[%s4836_s3] sm:$0xff]  }
  0xf5   :  { %3607 = vmatpush3.bf16.msra.mxu1 %v3922_v42  ;;  %3586 = vmatprep.subr.bf16.mxu0 %v3923_v43 }
  0xf6   :  { %3608 = vmatprep.subr.bf16.mxu1 %v3924_v44 }
  0xf8   :  { %3587 = vmatpush3.bf16.msra.mxu0 %v3925_v45 }
  0xf9   :  { %3609 = vmatpush3.bf16.msra.mxu1 %v3926_v46  ;;  %3588 = vmatprep.subr.bf16.mxu0 %v3927_v47 }
  0xfa   :  { %3610 = vmatprep.subr.bf16.mxu1 %v3928_v48 }
  0xfc   :  { %3589 = vmatpush3.bf16.msra.mxu0 %v3929_v49 }
  0xfd   :  { %3611 = vmatpush3.bf16.msra.mxu1 %v3930_v50  ;;  %3590 = vmatprep.subr.bf16.mxu0 %v3931_v51 }
  0xfe   :  { %3612 = vmatprep.subr.bf16.mxu1 %v3932_v52 }
 0x100   :  { %3591 = vmatpush3.bf16.msra.mxu0 %v3933_v53 }
 0x101   :  { %3613 = vmatpush3.bf16.msra.mxu1 %v3934_v54  ;;  %3629 = vmatprep.subr.bf16.mxu0 %v3949_v21 }
 0x103   :  { %v3328_v57 = vpop.f32.mrf.mxu0  ;;  %2797 = vmatmul.mubr.bf16.vlgmr.msra.gmra.mxu0 %v2999_v59 }
 0x104   :  { %v3350_v58 = vpop.f32.mrf.mxu1  ;;  %2837 = vmatmul.mubr.bf16.vlgmr.msra.gmra.mxu1 %v3001_v61  ;;  %3630 = vmatpush3.bf16.msra.mxu0 %v3939_v22 }
 0x105   :  { %v3329_v63 = vpop.f32.mrf.mxu0  ;;  %3631 = vmatprep.subr.bf16.mxu0 %v3949_v21  ;;  %3645 = vmatprep.mubr.msk.bf16.mxu0 %vm3950_vm0, %v3949_v21 }
 0x106   :  { %v3351_v0 = vpop.f32.mrf.mxu1  ;;  %v3330_v1 = vadd.f32 %v3329_v63, %v3328_v57 }
 0x107   :  { %v3352_v2 = vadd.f32 %v3351_v0, %v3350_v58  ;;  %v3331_v3 = vpop.f32.mrf.mxu0 }
 0x108   :  { %v3353_v4 = vpop.f32.mrf.mxu1  ;;  %v2319_v5 = vadd.f32 %v3330_v1, %v4716_v28  ;;  %3632 = vmatpush3.bf16.msra.mxu0 %v3940_v23 }
 0x109   :  { %v3332_v6 = vpop.f32.mrf.mxu0  ;;  %3633 = vmatprep.subr.bf16.mxu0 %v3949_v21 }
 0x10a   :  { %v3354_v7 = vpop.f32.mrf.mxu1  ;;  %v2359_v8 = vadd.f32 %v3352_v2, %v2319_v5 }
 0x10c   :  { %3634 = vmatpush3.bf16.msra.mxu0 %v3941_v24 }
 0x10d   :  { %3635 = vmatprep.subr.bf16.mxu0 %v3949_v21 }
 0x110   :  { %3636 = vmatpush3.bf16.msra.mxu0 %v3942_v25 }
 0x111   :  { %3637 = vmatprep.subr.bf16.mxu0 %v3949_v21 }
 0x114   :  { %3638 = vmatpush3.bf16.msra.mxu0 %v3943_v26 }
 0x115   :  { %3639 = vmatprep.subr.bf16.mxu0 %v3949_v21 }
 0x118   :  { %3640 = vmatpush3.bf16.msra.mxu0 %v3944_v36  ;;  %v2959_v36 = vlaneseq }
 0x119   :  { %3641 = vmatprep.subr.bf16.mxu0 %v3949_v21 }
 0x11c   :  { %3642 = vmatpush3.bf16.msra.mxu0 %v3945_v40 }
 0x11d   :  { %3643 = vmatprep.subr.bf16.mxu0 %v3949_v21 }
 0x120   :  { %3644 = vmatpush3.bf16.msra.mxu0 %v3946_v41 }
 0x123   :  { %v3372_v9 = vpop.f32.mrf.mxu0 }
 0x124   :  { %v3394_v10 = vpop.f32.mrf.mxu1 }
 0x125   :  { %v3373_v11 = vpop.f32.mrf.mxu0 }
 0x126   :  { %v3374_v12 = vadd.f32 %v3373_v11, %v3372_v9  ;;  %v3395_v13 = vpop.f32.mrf.mxu1 }
 0x127   :  { %v3396_v14 = vadd.f32 %v3395_v13, %v3394_v10  ;;  %v3375_v15 = vpop.f32.mrf.mxu0 }
 0x128   :  { %v2399_v16 = vadd.f32 %v3374_v12, %v2359_v8  ;;  %v3397_v17 = vpop.f32.mrf.mxu1 }
 0x129   :  { %v3376_v18 = vpop.f32.mrf.mxu0 }
 0x12a   :  { %v2439_v19 = vadd.f32 %v3396_v14, %v2399_v16  ;;  %v3398_v20 = vpop.f32.mrf.mxu1 }
 0x143   :  { %v3416_v27 = vpop.f32.mrf.mxu0 }
 0x144   :  { %v3438_v28 = vpop.f32.mrf.mxu1 }
 0x145   :  { %v3417_v29 = vpop.f32.mrf.mxu0 }
 0x146   :  { %v3418_v30 = vadd.f32 %v3417_v29, %v3416_v27  ;;  %v3439_v31 = vpop.f32.mrf.mxu1  ;;  %v3259_v29 = vld [vmem:[%s4837_s4] ss:$0 sm:$0xff] }
 0x147   :  { %v3440_v32 = vadd.f32 %v3439_v31, %v3438_v28  ;;  %v3419_v33 = vpop.f32.mrf.mxu0 }
 0x148   :  { %v2479_v34 = vadd.f32 %v3418_v30, %v2439_v19  ;;  %v3441_v35 = vpop.f32.mrf.mxu1 }
 0x149   :  { %v3420_v37 = vpop.f32.mrf.mxu0 }
 0x14a   :  { %v2519_v38 = vadd.f32 %v3440_v32, %v2479_v34  ;;  %v3442_v39 = vpop.f32.mrf.mxu1  ;;  %v2960_v37 = vand.u32 127, %v2959_v36 }
 0x14c   :  { %vm2961_vm2 = vcmp.eq.s32.totalorder %v2960_v37, 101 }
 0x163   :  { %v3460_v42 = vpop.f32.mrf.mxu0 }
 0x164   :  { %v3482_v43 = vpop.f32.mrf.mxu1 }
 0x165   :  { %v3461_v44 = vpop.f32.mrf.mxu0 }
 0x166   :  { %v3483_v45 = vpop.f32.mrf.mxu1  ;;  %v3462_v46 = vadd.f32 %v3461_v44, %v3460_v42 }
 0x167   :  { %v3484_v47 = vadd.f32 %v3483_v45, %v3482_v43  ;;  %v3463_v48 = vpop.f32.mrf.mxu0 }
 0x168   :  { %v3485_v49 = vpop.f32.mrf.mxu1  ;;  %v2559_v50 = vadd.f32 %v3462_v46, %v2519_v38 }
 0x169   :  { %v3464_v51 = vpop.f32.mrf.mxu0 }
 0x16a   :  { %v3486_v52 = vpop.f32.mrf.mxu1  ;;  %v2599_v53 = vadd.f32 %v3484_v47, %v2559_v50 }
 0x183   :  { %v3504_v54 = vpop.f32.mrf.mxu0 }
 0x184   :  { %v3526_v55 = vpop.f32.mrf.mxu1 }
 0x185   :  { %v3505_v56 = vpop.f32.mrf.mxu0 }
 0x186   :  { %v3527_v57 = vpop.f32.mrf.mxu1  ;;  %v3506_v6 = vadd.f32 %v3505_v56, %v3504_v54 }
 0x187   :  { %v3507_v58 = vpop.f32.mrf.mxu0  ;;  %v3528_v8 = vadd.f32 %v3527_v57, %v3526_v55 }
 0x188   :  { %v3529_v59 = vpop.f32.mrf.mxu1  ;;  %v2639_v7 = vadd.f32 %v3506_v6, %v2599_v53 }
 0x189   :  { %v3508_v60 = vpop.f32.mrf.mxu0 }
 0x18a   :  { %v3530_v61 = vpop.f32.mrf.mxu1  ;;  %v2679_v10 = vadd.f32 %v3528_v8, %v2639_v7 }
 0x1a3   :  { %v3548_v62 = vpop.f32.mrf.mxu0 }
 0x1a4   :  { %v3570_v63 = vpop.f32.mrf.mxu1 }
 0x1a5   :  { %v3549_v0 = vpop.f32.mrf.mxu0 }
 0x1a6   :  { %v3571_v1 = vpop.f32.mrf.mxu1  ;;  %v3550_v9 = vadd.f32 %v3549_v0, %v3548_v62 }
 0x1a7   :  { %v3551_v2 = vpop.f32.mrf.mxu0  ;;  %v3572_v12 = vadd.f32 %v3571_v1, %v3570_v63 }
 0x1a8   :  { %v3573_v3 = vpop.f32.mrf.mxu1  ;;  %v2719_v11 = vadd.f32 %v3550_v9, %v2679_v10 }
 0x1a9   :  { %v3552_v4 = vpop.f32.mrf.mxu0 }
 0x1aa   :  { %v3574_v5 = vpop.f32.mrf.mxu1  ;;  %v2759_v16 = vadd.f32 %v3572_v12, %v2719_v11 }
 0x1c3   :  { %v3592_v13 = vpop.f32.mrf.mxu0 }
 0x1c4   :  { %v3614_v14 = vpop.f32.mrf.mxu1 }
 0x1c5   :  { %v3593_v15 = vpop.f32.mrf.mxu0 }
 0x1c6   :  { %v3594_v17 = vadd.f32 %v3593_v15, %v3592_v13  ;;  %v3615_v18 = vpop.f32.mrf.mxu1 }
 0x1c7   :  { %v3595_v19 = vpop.f32.mrf.mxu0  ;;  %v3616_v21 = vadd.f32 %v3615_v18, %v3614_v14 }
 0x1c8   :  { %v2799_v20 = vadd.f32 %v3594_v17, %v2759_v16  ;;  %v3617_v22 = vpop.f32.mrf.mxu1 }
 0x1c9   :  { %v3596_v23 = vpop.f32.mrf.mxu0 }
 0x1ca   :  { %v2839_v24 = vadd.f32 %v3616_v21, %v2799_v20  ;;  %v3618_v25 = vpop.f32.mrf.mxu1 }
 0x1cc   :  { %vm2844_vm1 = vcmp.gt.f32.partialorder %v2839_v24, 0.0  ;;  %v2845_v26 = vmul.f32 0.1, %v2839_v24 }
 0x1ce   :  { %v2846_v27 = vsel %vm2844_vm1, %v2839_v24, %v2845_v26 }
 0x1cf   :  { %v2847_v28 = vpack.c.bf16 %v2846_v27, %v2846_v27 }
 0x1d1   :  { %3646 = vmatmul.mubr.bf16.vlgmr.msra.gmra.mxu0 %v2847_v28 }
 0x291   :  { %v2953_v30 = vpop.f32.mrf.mxu0 }
 0x292   :  { %v2954_v31 = vadd.f32 %v3259_v29, %v2953_v30 }
 0x293   :  { %v3647_v32 = vpop.f32.mrf.mxu0 }
 0x294   :  { %v2962_v33 = vmul.f32 1.442695, %v2954_v31 }
 0x295   :  { %v2956_v34 = vpop.f32.mrf.mxu0 }
 0x296   :  { %3947 = vpow2.f32 %v2962_v33 }
 0x297   :  { %v3648_v35 = vpop.f32.mrf.mxu0 }
 0x2a3   :  { %v3948_v38 = vpop.eup %3947 }
 0x2a4   :  { %v2964_v39 = vsel %vm2961_vm2, %v3948_v38, %v2954_v31 }
 0x2a5   :  { %2965 = vst [vmem:[%s4838_s5] sm:$0xff] %v2964_v39 }

</bundles_post_ra>
